<compile_context>
chip_gen: v7x
topology: tpu7x:2x2x1
jax: 0.10.0
libtpu: 0.0.40
codegen_flags: <defaults>
</compile_context>

<pallas_src>
import functools

import jax
import jax.numpy as jnp
from jax.experimental import pallas as pl
from jax.experimental.pallas import tpu as pltpu

MEAN = [0.485, 0.456, 0.406]
STD = [0.229, 0.224, 0.225]


def _preprocess_kernel(x_ref, sel_ref, o_ref, *, scale, offset, num_channels):
    # x_ref  : (1, R, W*C)  interleaved NHWC rows (lane-dense, contiguous DMA)
    # sel_ref: (C, W*C, W)  0/1 de-interleave matrices, resident in VMEM
    # o_ref  : (1, C, R, W) NCHW output block
    x = x_ref[0]  # (R, W*C)
    for c in range(num_channels):  # static unroll (C == 3)
        plane = jnp.dot(
            x,
            sel_ref[c],
            preferred_element_type=jnp.float32,
            precision=jax.lax.Precision.HIGHEST,
        )  # (R, W): plane[r, w] == x[r, w*C + c]  (exact gather via MXU)
        o_ref[0, c, :, :] = plane * scale[c] + offset[c]


def _pick_row_block(H, W, C, target_bytes=2 * 1024 * 1024):
    """Rows per grid step: MiB-scale blocks, multiple of 8, divides H."""
    bytes_per_row = W * C * 4
    if H * bytes_per_row <= target_bytes:
        return H
    best = None
    for r in range(8, H, 8):
        if H % r == 0 and r * bytes_per_row <= target_bytes:
            best = r
    return best if best is not None else H


def preprocessing_layer(x_nhwc, mean=MEAN, std=STD):
    """x_nhwc: (N, H, W, C) float in [0, 255]. Returns (N, C, H, W) normalized."""
    x_nhwc = x_nhwc.astype(jnp.float32)
    N, H, W, C = x_nhwc.shape
    R = _pick_row_block(H, W, C)

    # Free reshape of the contiguous NHWC tensor -> lane-dense (N, H, W*C).
    x_flat = x_nhwc.reshape(N, H, W * C)

    # 0/1 channel de-interleave matrices: sel[c, l, w] = 1 iff l == w*C + c.
    l_idx = jnp.arange(W * C, dtype=jnp.int32)[None, :, None]
    w_idx = jnp.arange(W, dtype=jnp.int32)[None, None, :]
    c_idx = jnp.arange(C, dtype=jnp.int32)[:, None, None]
    sel = (l_idx == w_idx * C + c_idx).astype(jnp.float32)  # (C, W*C, W)

    # Fold (x/255 - mean)/std into a single multiply-add.
    scale = tuple(float(1.0 / (255.0 * s)) for s in std)
    offset = tuple(float(-m / s) for m, s in zip(mean, std))

    kernel = functools.partial(
        _preprocess_kernel, scale=scale, offset=offset, num_channels=C
    )

    grid = (N, H // R)
    return pl.pallas_call(
        kernel,
        out_shape=jax.ShapeDtypeStruct((N, C, H, W), jnp.float32),
        grid=grid,
        in_specs=[
            pl.BlockSpec((1, R, W * C), lambda n, h: (n, h, 0)),
            # constant index_map -> fetched once, stays resident in VMEM
            pl.BlockSpec((C, W * C, W), lambda n, h: (0, 0, 0)),
        ],
        out_specs=pl.BlockSpec((1, C, R, W), lambda n, h: (n, 0, h, 0)),
        compiler_params=pltpu.CompilerParams(
            dimension_semantics=("parallel", "parallel"),
        ),
    )(x_flat, sel)


if __name__ == "__main__":
    key = jax.random.PRNGKey(0)
    N, H, W, C = 2, 16, 16, 3  # NHWC input, RGB, values in [0, 255]
    x = jax.random.uniform(
        key, (N, H, W, C), dtype=jnp.float32, minval=0.0, maxval=255.0
    )

    out = preprocessing_layer(x, MEAN, STD)
    out = jax.block_until_ready(out)

    # reference (pure JAX) check
    mean_arr = jnp.asarray(MEAN, dtype=jnp.float32).reshape(1, 3, 1, 1)
    std_arr = jnp.asarray(STD, dtype=jnp.float32).reshape(1, 3, 1, 1)
    ref = (jnp.transpose(x, (0, 3, 1, 2)) / 255.0 - mean_arr) / std_arr

    assert out.shape == (N, C, H, W)
    assert jnp.allclose(out, ref, atol=1e-5, rtol=1e-5), float(
        jnp.max(jnp.abs(out - ref))
    )

    print("KERNEL_OK")
</pallas_src>

<mosaic_0001>
module attributes {stable_mosaic.version = 11 : i64} {
  func.func @_preprocess_kernel(%arg0: i32, %arg1: i32, %arg2: memref<1x16x48xf32, #tpu.memory_space<vmem>>, %arg3: memref<3x48x16xf32, #tpu.memory_space<vmem>>, %arg4: memref<1x3x16x16xf32, #tpu.memory_space<vmem>>) attributes {dimension_semantics = [#tpu.dimension_semantics<parallel>, #tpu.dimension_semantics<parallel>], iteration_bounds = array<i64: 2, 1>, scalar_prefetch = 0 : i64, scratch_operands = 0 : i64, tpu.core_type = #tpu.core_type<tc>, window_params = [{transform_indices = @transform_0, window_bounds = array<i64: 1, 16, 48>}, {pipeline_mode = #tpu.pipeline_mode<synchronous>, transform_indices = @transform_1, window_bounds = array<i64: 3, 48, 16>}, {transform_indices = @transform_2, window_bounds = array<i64: 1, 3, 16, 16>}]} {
    %c0 = arith.constant 0 : index
    %c0_0 = arith.constant 0 : index
    %c0_1 = arith.constant 0 : index
    %0 = vector.load %arg2[%c0, %c0_0, %c0_1] : memref<1x16x48xf32, #tpu.memory_space<vmem>>, vector<1x16x48xf32>
    %1 = vector.shape_cast %0 : vector<1x16x48xf32> to vector<16x48xf32>
    %c0_2 = arith.constant 0 : index
    %c0_3 = arith.constant 0 : index
    %c0_4 = arith.constant 0 : index
    %2 = vector.load %arg3[%c0_2, %c0_3, %c0_4] : memref<3x48x16xf32, #tpu.memory_space<vmem>>, vector<1x48x16xf32>
    %3 = vector.shape_cast %2 : vector<1x48x16xf32> to vector<48x16xf32>
    %cst = arith.constant dense<0.000000e+00> : vector<16x16xf32>
    %4 = tpu.matmul %1, %3, %cst {dimension_numbers = #tpu.dot_dimension_numbers<[1], [0], [0], [1], [0, 0, 1, 1], [], []>, precision = #tpu.contract_precision<fp32>} : vector<16x48xf32>, vector<48x16xf32>, vector<16x16xf32> -> vector<16x16xf32>
    %cst_5 = arith.constant 0.0171247534 : f32
    %5 = vector.broadcast %cst_5 : f32 to vector<16x16xf32>
    %6 = arith.mulf %4, %5 : vector<16x16xf32>
    %cst_6 = arith.constant -2.11790395 : f32
    %7 = vector.broadcast %cst_6 : f32 to vector<16x16xf32>
    %8 = arith.addf %6, %7 : vector<16x16xf32>
    %c0_7 = arith.constant 0 : index
    %c0_8 = arith.constant 0 : index
    %c0_9 = arith.constant 0 : index
    %c0_10 = arith.constant 0 : index
    %9 = vector.load %arg4[%c0_7, %c0_8, %c0_9, %c0_10] : memref<1x3x16x16xf32, #tpu.memory_space<vmem>>, vector<1x1x16x16xf32>
    %10 = vector.shape_cast %9 : vector<1x1x16x16xf32> to vector<16x16xf32>
    %11 = vector.shape_cast %8 : vector<16x16xf32> to vector<1x1x16x16xf32>
    tpu.vector_store %arg4[%c0_7, %c0_8, %c0_9, %c0_10], %11 {strides = array<i32>} : memref<1x3x16x16xf32, #tpu.memory_space<vmem>>, vector<1x1x16x16xf32>,
    %c1 = arith.constant 1 : index
    %c0_11 = arith.constant 0 : index
    %c0_12 = arith.constant 0 : index
    %12 = vector.load %arg3[%c1, %c0_11, %c0_12] : memref<3x48x16xf32, #tpu.memory_space<vmem>>, vector<1x48x16xf32>
    %13 = vector.shape_cast %12 : vector<1x48x16xf32> to vector<48x16xf32>
    %cst_13 = arith.constant dense<0.000000e+00> : vector<16x16xf32>
    %14 = tpu.matmul %1, %13, %cst_13 {dimension_numbers = #tpu.dot_dimension_numbers<[1], [0], [0], [1], [0, 0, 1, 1], [], []>, precision = #tpu.contract_precision<fp32>} : vector<16x48xf32>, vector<48x16xf32>, vector<16x16xf32> -> vector<16x16xf32>
    %cst_14 = arith.constant 0.0175070036 : f32
    %15 = vector.broadcast %cst_14 : f32 to vector<16x16xf32>
    %16 = arith.mulf %14, %15 : vector<16x16xf32>
    %cst_15 = arith.constant -2.03571439 : f32
    %17 = vector.broadcast %cst_15 : f32 to vector<16x16xf32>
    %18 = arith.addf %16, %17 : vector<16x16xf32>
    %c0_16 = arith.constant 0 : index
    %c1_17 = arith.constant 1 : index
    %c0_18 = arith.constant 0 : index
    %c0_19 = arith.constant 0 : index
    %19 = vector.load %arg4[%c0_16, %c1_17, %c0_18, %c0_19] : memref<1x3x16x16xf32, #tpu.memory_space<vmem>>, vector<1x1x16x16xf32>
    %20 = vector.shape_cast %19 : vector<1x1x16x16xf32> to vector<16x16xf32>
    %21 = vector.shape_cast %18 : vector<16x16xf32> to vector<1x1x16x16xf32>
    tpu.vector_store %arg4[%c0_16, %c1_17, %c0_18, %c0_19], %21 {strides = array<i32>} : memref<1x3x16x16xf32, #tpu.memory_space<vmem>>, vector<1x1x16x16xf32>,
    %c2 = arith.constant 2 : index
    %c0_20 = arith.constant 0 : index
    %c0_21 = arith.constant 0 : index
    %22 = vector.load %arg3[%c2, %c0_20, %c0_21] : memref<3x48x16xf32, #tpu.memory_space<vmem>>, vector<1x48x16xf32>
    %23 = vector.shape_cast %22 : vector<1x48x16xf32> to vector<48x16xf32>
    %cst_22 = arith.constant dense<0.000000e+00> : vector<16x16xf32>
    %24 = tpu.matmul %1, %23, %cst_22 {dimension_numbers = #tpu.dot_dimension_numbers<[1], [0], [0], [1], [0, 0, 1, 1], [], []>, precision = #tpu.contract_precision<fp32>} : vector<16x48xf32>, vector<48x16xf32>, vector<16x16xf32> -> vector<16x16xf32>
    %cst_23 = arith.constant 0.0174291935 : f32
    %25 = vector.broadcast %cst_23 : f32 to vector<16x16xf32>
    %26 = arith.mulf %24, %25 : vector<16x16xf32>
    %cst_24 = arith.constant -1.80444443 : f32
    %27 = vector.broadcast %cst_24 : f32 to vector<16x16xf32>
    %28 = arith.addf %26, %27 : vector<16x16xf32>
    %c0_25 = arith.constant 0 : index
    %c2_26 = arith.constant 2 : index
    %c0_27 = arith.constant 0 : index
    %c0_28 = arith.constant 0 : index
    %29 = vector.load %arg4[%c0_25, %c2_26, %c0_27, %c0_28] : memref<1x3x16x16xf32, #tpu.memory_space<vmem>>, vector<1x1x16x16xf32>
    %30 = vector.shape_cast %29 : vector<1x1x16x16xf32> to vector<16x16xf32>
    %31 = vector.shape_cast %28 : vector<16x16xf32> to vector<1x1x16x16xf32>
    tpu.vector_store %arg4[%c0_25, %c2_26, %c0_27, %c0_28], %31 {strides = array<i32>} : memref<1x3x16x16xf32, #tpu.memory_space<vmem>>, vector<1x1x16x16xf32>,
    return
  }
  func.func @transform_0(%arg0: i32, %arg1: i32) -> (i32, i32, i32) {
    %c0_i32 = arith.constant 0 : i32
    %c0_i32_0 = arith.constant 0 : i32
    return %arg0, %arg1, %c0_i32 : i32, i32, i32
  }
  func.func @transform_1(%arg0: i32, %arg1: i32) -> (i32, i32, i32) {
    %c0_i32 = arith.constant 0 : i32
    %c0_i32_0 = arith.constant 0 : i32
    %c0_i32_1 = arith.constant 0 : i32
    %c0_i32_2 = arith.constant 0 : i32
    return %c0_i32, %c0_i32_0, %c0_i32_1 : i32, i32, i32
  }
  func.func @transform_2(%arg0: i32, %arg1: i32) -> (i32, i32, i32, i32) {
    %c0_i32 = arith.constant 0 : i32
    %c0_i32_0 = arith.constant 0 : i32
    %c0_i32_1 = arith.constant 0 : i32
    return %arg0, %c0_i32, %arg1, %c0_i32_0 : i32, i32, i32, i32
  }
}

</mosaic_0001>

<bundles_post_ra>
// kernel: tpu_custom_call.1
= control target key start
LH: loop header
LB: loop body
LE: loop exit
PB: predicated region body
PF: predicated region fallthrough
CT: control target
= control target key end

     0   :  { %7 = vsyncpa [#allocation3], 0  ;;  %s3275_s0 = inlined_call_operand.vmem [shape: f32[2,16,48], index: 0, kind: input, shape index: {}]   ;;  %s3276_s1 = inlined_call_operand.vmem [shape: f32[3,48,16], index: 1, kind: input, shape index: {}]   ;;  %s3277_s2 = inlined_call_operand.hbm [shape: f32[2,3,16,16], index: 2, kind: output, shape index: {}]  }
   0x1   :  { %9 = vsyncpa [#allocation3 + $0x1], 0  ;;  %s2824_s9 = smov 0   ;;  %s2826_s10 = smov 0  }
   0x2   :  { %s2828_s11 = smov 0   ;;  %s2830_s12 = smov 0  }
   0x3   :  { %s2832_s13 = smov 0   ;;  %s2834_s14 = smov 0  }
   0x4 LB: > { %s1980_s15 = sadd.s32 4294967295, %s2804_s14   ;;  %s1981_s16 = sadd.s32 4294967294, %s2804_s14   ;;  %s2804_s14 = sphi %s2834_s14, %s15_s14   ;;  %s2800_s13 = sphi %s2832_s13, %s3284_s13   ;;  %s2796_s12 = sphi %s2830_s12, %s3283_s12   ;;  %s2792_s11 = sphi %s2828_s11, %s3282_s11   ;;  %s2788_s10 = sphi %s2826_s10, %s3281_s10   ;;  %s2784_s9 = sphi %s2824_s9, %s3280_s9  }
   0x5   : > { %s27_s17 = sadd.s32 1, %s2800_s13  ;;  %s85_s18 = sadd.s32 1, %s2792_s11 }
   0x6   : > { %p29_p0 = scmp.ge.s32.totalorder %s27_s17, 2  ;;  %p95_p1 = scmp.ne.s32.totalorder %s2792_s11, %s2788_s10 }
   0x7   : > { %p96_p2 = scmp.eq.s32.totalorder %s1980_s15, 1  ;;  %p101_p3 = scmp.ne.s32.totalorder %s2788_s10, %s2784_s9 }
   0x8   : > { %s3286_s17 = smov (%p29_p0, %s27_s17), 0  ;;  %p102_p5 = scmp.eq.s32.totalorder %s1981_s16, 1 }
   0x9   : > { %p2864_p4 = por %p96_p2, %p95_p1  ;;  %s80_s20 = ssub.s32 %s2800_s13, %s3286_s17 }
   0xa   : > { %p1984_p6 = scmp.ge.s32.totalorder %s2804_s14, 1  ;;  %p83_p7 = scmp.eq.s32.totalorder %s80_s20, 0 }
   0xb   : > { %p2871_p8 = por %p102_p5, %p101_p3  ;;  %p136_p9 = scmp.lt.s32.totalorder %s2804_s14, 3 }
   0xc   : > { %s2877_s22 = scalar_select %p83_p7, %s2792_s11, %s85_s18  }
   0xd   : > { %p137_p10 = pnand %p1984_p6, %p136_p9 }
   0xe   : > { %v175_v0 = vld [vmem:[%s3276_s1] sm:$0xff] (!%p137_p10)  ;;  %v176_v1 = vld [vmem:[%s3276_s1 + $0x8] sm:$0xff] (!%p137_p10)  ;;  %v177_v2 = vld [vmem:[%s3276_s1 + $0x10] sm:$0xff] (!%p137_p10)  ;;  %p163_p11 = scmp.lt.s32.totalorder (!%p137_p10), %s2796_s12, 1  ;;  %vm181_vm0 = vcmask (!%p137_p10), 392192   ;;  %s159_s28 = sand.u32 (!%p137_p10), 1, %s2788_s10  }
   0xf   : > { %140 = sbr.rel (%p137_p10) target bundleno = 367 (0x16f), region = 28  ;;  %v189_v3 = vand.u32 (!%p137_p10), 4294901760, %v175_v0  ;;  %v192_v4 = vand.u32 (!%p137_p10), 4294901760, %v176_v1  ;;  %v178_v5 = vld [vmem:[%s3276_s1 + $0x18] sm:$0xff] (!%p137_p10)  ;;  %v195_v6 = vand.u32 (!%p137_p10), 4294901760, %v177_v2  ;;  %v179_v7 = vld [vmem:[%s3276_s1 + $0x20] sm:$0xff] (!%p137_p10) }
  0x10   : > { %v180_v8 = vld [vmem:[%s3276_s1 + $0x28] sm:$0xff] (!%p137_p10)  ;;  %v198_v9 = vand.u32 (!%p137_p10), 4294901760, %v178_v5  ;;  %v201_v10 = vand.u32 (!%p137_p10), 4294901760, %v179_v7  ;;  %v1995_v60 = vld [vmem:[%s3276_s1 + $0x60] sm:$0xff] (!%p137_p10)  ;;  %v1987_v62 = vld [vmem:[%s3276_s1 + $0x30] sm:$0xff] (!%p137_p10)  ;;  %s2667_s29 = smul.u32 (!%p137_p10), 48, %s159_s28 }
  0x11   : > { %v204_v11 = vand.u32 (!%p137_p10), 4294901760, %v180_v8  ;;  %v2899_v12 = vpack.c.bf16 (!%p137_p10), %v192_v4, %v189_v3  ;;  %v2901_v13 = vsub.f32 (!%p137_p10), %v175_v0, %v189_v3  ;;  %v2903_v14 = vsub.f32 (!%p137_p10), %v176_v1, %v192_v4  ;;  %v1996_v61 = vld [vmem:[%s3276_s1 + $0x68] sm:$0xff] (!%p137_p10)  ;;  %v1988_v63 = vld [vmem:[%s3276_s1 + $0x38] sm:$0xff] (!%p137_p10)  ;;  %v1997_v3 = vld [vmem:[%s3276_s1 + $0x70] sm:$0xff] (!%p137_p10)  ;;  %s2668_s3 = smul.u32 (!%p137_p10), 768, %s2796_s12  ;;  %s2806_s15 = smov (!%p137_p10), [#allocation2]  }
  0x12   : > { %v2905_v15 = vsub.f32 (!%p137_p10), %v177_v2, %v195_v6  ;;  %v2907_v16 = vpack.c.bf16 (!%p137_p10), %v198_v9, %v195_v6  ;;  %v2909_v17 = vsub.f32 (!%p137_p10), %v178_v5, %v198_v9  ;;  %v2911_v18 = vsub.f32 (!%p137_p10), %v179_v7, %v201_v10  ;;  %v1998_v4 = vld [vmem:[%s3276_s1 + $0x78] sm:$0xff] (!%p137_p10)  ;;  %s161_s30 = scalar_lea.vmem (!%p137_p10), [#allocation2], %s2667_s29  ;;  %s2730_s16 = sshll.u32 (!%p137_p10), %s2806_s15, 4  ;;  %s2731_s16 = int_to_ptr.vmem [resolvable:$false] %s2730_s16 }
  0x13   : > { %2458 = vmatprep.subr.bf16.mxu0 (!%p137_p10), %v2899_v12  ;;  %2422 = vmatprep.subr.bf16.mxu1 (!%p137_p10), %v2899_v12  ;;  %v282_v19 = vand.u32 (!%p137_p10), 4294901760, %v2901_v13  ;;  %v289_v20 = vand.u32 (!%p137_p10), 4294901760, %v2903_v14  ;;  %v2924_v25 = vsub.f32 (!%p137_p10), %v180_v8, %v204_v11  ;;  %v2928_v26 = vpack.c.bf16 (!%p137_p10), %v204_v11, %v201_v10  ;;  %v1989_v11 = vld [vmem:[%s3276_s1 + $0x40] sm:$0xff] (!%p137_p10)  ;;  %s1901_s4 = sshll.u32 (!%p137_p10), %s161_s30, 4  ;;  %s3222_s4 = int_to_ptr.vmem [resolvable:$true] %s1901_s4 }
  0x14   : > { %v296_v21 = vand.u32 (!%p137_p10), 4294901760, %v2905_v15  ;;  %2460 = vmatpush3.bf16.msra.mxu0 (!%p137_p10), %v2899_v12  ;;  %2424 = vmatpush3.bf16.msra.mxu1 (!%p137_p10), %v2899_v12  ;;  %v303_v24 = vand.u32 (!%p137_p10), 4294901760, %v2909_v17  ;;  %v310_v33 = vand.u32 (!%p137_p10), 4294901760, %v2911_v18  ;;  %v2445_v59 = vpack.c.bf16 (!%p137_p10), %v2903_v14, %v2901_v13  ;;  %p2733_p1 = scmp.lt.s32.totalorder (!%p137_p10), %s3222_s4, %s2731_s16 }
  0x15   : > { %2462 = vmatprep.subr.bf16.mxu0 (!%p137_p10), %v2907_v16  ;;  %2426 = vmatprep.subr.bf16.mxu1 (!%p137_p10), %v2907_v16  ;;  %v283_v28 = vsub.f32 (!%p137_p10), %v2901_v13, %v282_v19  ;;  %v290_v29 = vsub.f32 (!%p137_p10), %v2903_v14, %v289_v20  ;;  %v317_v39 = vand.u32 (!%p137_p10), 4294901760, %v2924_v25  ;;  %v2469_v40 = vpack.c.bf16 (!%p137_p10), %v289_v20, %v282_v19  ;;  %v1999_v19 = vld [vmem:[%s3276_s1 + $0x80] sm:$0xff] (!%p137_p10)  ;;  %v2000_v20 = vld [vmem:[%s3276_s1 + $0x88] sm:$0xff] (!%p137_p10) }
  0x16   : > { %s164_s7 = scalar_select %p163_p11, %s2796_s12, 1  ;;  %v297_v32 = vsub.f32 %v2905_v15, %v296_v21  ;;  %v304_v37 = vsub.f32 %v2909_v17, %v303_v24  ;;  %v311_v47 = vsub.f32 %v2911_v18, %v310_v33  ;;  %v2473_v51 = vpack.c.bf16 %v303_v24, %v296_v21  ;;  %v1992_v24 = vld [vmem:[%s3276_s1 + $0x58] sm:$0xff] }
  0x17   : > { %v284_v34 = vand.u32 4294901760, %v283_v28  ;;  %v291_v35 = vand.u32 4294901760, %v290_v29  ;;  %v318_v48 = vsub.f32 %v2924_v25, %v317_v39  ;;  %v2477_v57 = vpack.c.bf16 %v317_v39, %v310_v33  ;;  %s3229_s12 = scalar_lea.sflag [#allocation3], %s159_s28 }
  0x18   : > { %s2006_s8 = sshll.u32 %s164_s7, 4  ;;  %2464 = vmatpush3.bf16.msra.mxu0 %v2907_v16  ;;  %2428 = vmatpush3.bf16.msra.mxu1 %v2907_v16  ;;  %v298_v44 = vand.u32 4294901760, %v297_v32  ;;  %v305_v46 = vand.u32 4294901760, %v304_v37  ;;  %v312_v55 = vand.u32 4294901760, %v311_v47  ;;  %v1325_v0 = vand.u32 4294901760, %v1995_v60  ;;  %s3220_s7 = scalar_lea.hbm %s3277_s2, %s2668_s3 }
  0x19   : > { %s170_s18 = scalar_lea.vmem %s3275_s0, %s2006_s8  ;;  %2466 = vmatprep.subr.bf16.mxu0 %v2928_v26  ;;  %2430 = vmatprep.subr.bf16.mxu1 %v2928_v26  ;;  %v2433_v43 = vpack.c.bf16 %v291_v35, %v284_v34  ;;  %v319_v56 = vand.u32 4294901760, %v318_v48  ;;  %v1328_v1 = vand.u32 4294901760, %v1996_v61  ;;  %v2449_v2 = vpack.c.bf16 %v2909_v17, %v2905_v15  ;;  %s2726_s8 = scalar_lea.vmem %s3222_s4, 768 }
  0x1a   : > { %v173_v22 = vld [vmem:[%s170_s18] sm:$0xff]  ;;  %v174_v23 = vld [vmem:[%s170_s18 + $0x8] sm:$0xff]  ;;  %v2437_v54 = vpack.c.bf16 %v305_v46, %v298_v44  ;;  %v757_v5 = vand.u32 4294901760, %v1987_v62  ;;  %v760_v6 = vand.u32 4294901760, %v1988_v63  ;;  %v3002_v7 = vsub.f32 %v1995_v60, %v1325_v0  ;;  %p2727_p12 = scmp.ne.s32.totalorder %s3222_s4, %s2726_s8  ;;  %s2732_s18 = scalar_lea.vmem %s2731_s16, 1536 }
  0x1b   : > { %v183_v27 = vsel %vm181_vm0, %v173_v22, 0  ;;  %v186_v31 = vsel %vm181_vm0, %v174_v23, 0  ;;  %v2441_v58 = vpack.c.bf16 %v319_v56, %v312_v55  ;;  %v3004_v8 = vsub.f32 %v1996_v61, %v1328_v1  ;;  %p2734_p2 = scmp.lt.s32.totalorder %s2732_s18, %s2726_s8 }
  0x1c   : > { %v2933_v30 = vand.u32 4294901760, %v183_v27  ;;  %v2938_v36 = vand.u32 4294901760, %v186_v31  ;;  %2468 = vmatpush3.bf16.msra.mxu0 %v2928_v26  ;;  %2432 = vmatpush3.bf16.msra.mxu1 %v2928_v26  ;;  %v1331_v9 = vand.u32 4294901760, %v1997_v3  ;;  %v1334_v10 = vand.u32 4294901760, %v1998_v4  ;;  %p2728_p13 = pnand %p2727_p12, %p2864_p4 }
  0x1d   : > { %2470 = vmatprep.subr.bf16.mxu0 %v2469_v40  ;;  %2434 = vmatprep.subr.bf16.mxu1 %v2433_v43  ;;  %v3015_v13 = vsub.f32 %v1987_v62, %v757_v5  ;;  %v3017_v14 = vsub.f32 %v1988_v63, %v760_v6  ;;  %v2453_v15 = vpack.c.bf16 %v2924_v25, %v2911_v18  ;;  %v1418_v21 = vand.u32 4294901760, %v3002_v7  ;;  %p2735_p3 = por %p2734_p2, %p2733_p1 }
  0x1e   : > { %v2944_v38 = vsub.f32 %v183_v27, %v2933_v30  ;;  %v2950_v41 = vsub.f32 %v186_v31, %v2938_v36  ;;  %v3022_v17 = vpack.c.bf16 %v1328_v1, %v1325_v0  ;;  %v1425_v22 = vand.u32 4294901760, %v3004_v8  ;;  %p2729_p0 = pneg %p2728_p13 }
  0x1f   : > { %v763_v23 = vand.u32 4294901760, %v1989_v11  ;;  %v3039_v25 = vsub.f32 %v1997_v3, %v1331_v9  ;;  %v3041_v27 = vsub.f32 %v1998_v4, %v1334_v10  ;;  %v3043_v28 = vpack.c.bf16 %v760_v6, %v757_v5 }
  0x20   : > { %v2953_v42 = vand.u32 4294901760, %v2944_v38  ;;  %v2956_v45 = vand.u32 4294901760, %v2950_v41  ;;  %v3045_v29 = vpack.c.bf16 %v1334_v10, %v1331_v9  ;;  %v850_v31 = vand.u32 4294901760, %v3015_v13  ;;  %p2736_p5 = pnand %p2735_p3, %p2729_p0 }
  0x21   : > { %v857_v32 = vand.u32 4294901760, %v3017_v14  ;;  %v1337_v33 = vand.u32 4294901760, %v1999_v19  ;;  %v1340_v34 = vand.u32 4294901760, %v2000_v20  ;;  %v3049_v35 = vsub.f32 %v1989_v11, %v763_v23 }
  0x22   : > { %v262_v49 = vsub.f32 %v2944_v38, %v2953_v42  ;;  %2208 = vmatprep.mubr.f32.mxu0 %v2953_v42  ;;  %v272_v50 = vsub.f32 %v2950_v41, %v2956_v45  ;;  %v1426_v44 = vsub.f32 %v3004_v8, %v1425_v22  ;;  %v1432_v46 = vand.u32 4294901760, %v3039_v25 }
  0x23   : > { %2209 = vmatmul.mubr.f32.vlgmr.msra.gmra.mrb[0].mxu0 %v2956_v45  ;;  %v1439_v47 = vand.u32 4294901760, %v3041_v27  ;;  %v3063_v48 = vsub.f32 %v1999_v19, %v1337_v33  ;;  %vm746_vm1 = vcmask 130048  }
  0x24   : > { %v2967_v52 = vand.u32 4294901760, %v262_v49  ;;  %v2970_v53 = vand.u32 4294901760, %v272_v50  ;;  %2472 = vmatpush3.bf16.msra.mxu0 %v2469_v40  ;;  %2223 = vmatprep.mubr.f32.mxu0 %v2933_v30  ;;  %v772_v40 = vand.u32 4294901760, %v1992_v24  ;;  %v3065_v49 = vsub.f32 %v2000_v20, %v1340_v34 }
  0x25   : > { %2474 = vmatprep.subr.bf16.mxu0 %v2473_v51  ;;  %v851_v50 = vsub.f32 %v3015_v13, %v850_v31  ;;  %v1427_v60 = vand.u32 4294901760, %v1426_v44  ;;  %v1433_v61 = vsub.f32 %v3039_v25, %v1432_v46  ;;  %v1440_v62 = vsub.f32 %v3041_v27, %v1439_v47 }
  0x26   : > { %2163 = vmatprep.mubr.f32.mxu1 %v2967_v52  ;;  %v1446_v63 = vand.u32 4294901760, %v3063_v48  ;;  %v1453_v0 = vand.u32 4294901760, %v3065_v49 }
  0x27   : > { %2164 = vmatmul.mubr.f32.vlgmr.msra.gmra.mrb[0].mxu1 %v2970_v53  ;;  %v1441_v11 = vand.u32 4294901760, %v1440_v62 }
  0x28   : > { %2436 = vmatpush3.bf16.msra.mxu1 %v2433_v43  ;;  %2178 = vmatprep.mubr.f32.mxu1 %v2933_v30  ;;  %v1419_v43 = vsub.f32 %v3002_v7, %v1418_v21 }
  0x29   : > { %2438 = vmatprep.subr.bf16.mxu1 %v2437_v54  ;;  %2476 = vmatpush3.bf16.msra.mxu0 %v2473_v51  ;;  %v858_v51 = vsub.f32 %v3017_v14, %v857_v32 }
  0x2a   : > { %2478 = vmatprep.subr.bf16.mxu0 %v2477_v57 }
  0x2b   : > { %v859_v3 = vand.u32 4294901760, %v858_v51  ;;  %v2589_v51 = vpack.c.bf16 %v3004_v8, %v3002_v7  ;;  %v2621_v8 = vpack.c.bf16 %v1453_v0, %v1446_v63 }
  0x2c   : > { %2440 = vmatpush3.bf16.msra.mxu1 %v2437_v54  ;;  %v864_v54 = vand.u32 4294901760, %v3049_v35 }
  0x2d   : > { %2442 = vmatprep.subr.bf16.mxu1 %v2441_v58  ;;  %2480 = vmatpush3.bf16.msra.mxu0 %v2477_v57  ;;  %v3081_v57 = vsub.f32 %v1992_v24, %v772_v40 }
  0x2e   : > { %2482 = vmatprep.subr.bf16.mxu0 %v2899_v12  ;;  %v865_v4 = vsub.f32 %v3049_v35, %v864_v54 }
  0x2f   : > { %v885_v9 = vand.u32 4294901760, %v3081_v57 }
  0x30   : > { %2444 = vmatpush3.bf16.msra.mxu1 %v2441_v58  ;;  %2224 = vmatmul.mubr.f32.vlgmr.msra.gmra.mrb[0].mxu0 %v2938_v36  ;;  %v3084_v58 = vpack.c.bf16 %v1340_v34, %v1337_v33  ;;  %v866_v20 = vand.u32 4294901760, %v865_v4 }
  0x31   : > { %2446 = vmatprep.subr.bf16.mxu1 %v2445_v59  ;;  %2484 = vmatpush3.bf16.msra.mxu0 %v2899_v12  ;;  %v1990_v12 = vld [vmem:[%s3276_s1 + $0x48] sm:$0xff] }
  0x32   : > { %2238 = vmatprep.mubr.f32.mxu0 %v2933_v30  ;;  %2486 = vmatprep.subr.bf16.mxu0 %v2907_v16  ;;  %v766_v18 = vand.u32 4294901760, %v1990_v12 }
  0x33   : > { %2179 = vmatmul.mubr.f32.vlgmr.msra.gmra.mrb[0].mxu1 %v2938_v36 }
  0x34   : > { %2448 = vmatpush3.bf16.msra.mxu1 %v2445_v59  ;;  %2193 = vmatprep.mubr.f32.mxu1 %v2944_v38  ;;  %v3051_v37 = vsub.f32 %v1990_v12, %v766_v18  ;;  %v1420_v59 = vand.u32 4294901760, %v1419_v43  ;;  %v1447_v12 = vsub.f32 %v3063_v48, %v1446_v63 }
  0x35   : > { %2450 = vmatprep.subr.bf16.mxu1 %v2449_v2  ;;  %2488 = vmatpush3.bf16.msra.mxu0 %v2907_v16  ;;  %v1991_v16 = vld [vmem:[%s3276_s1 + $0x50] sm:$0xff] }
  0x36   : > { %2490 = vmatprep.subr.bf16.mxu0 %v2928_v26  ;;  %v769_v39 = vand.u32 4294901760, %v1991_v16  ;;  %v871_v55 = vand.u32 4294901760, %v3051_v37  ;;  %v2577_v10 = vpack.c.bf16 %v1427_v60, %v1420_v59  ;;  %v1448_v33 = vand.u32 4294901760, %v1447_v12 }
  0x37   : > { %v2517_v59 = vpack.c.bf16 %v3017_v14, %v3015_v13  ;;  %v2521_v60 = vpack.c.bf16 %v3051_v37, %v3049_v35 }
  0x38   : > { %2452 = vmatpush3.bf16.msra.mxu1 %v2449_v2  ;;  %v3079_v56 = vsub.f32 %v1991_v16, %v769_v39  ;;  %v3098_v1 = vpack.c.bf16 %v772_v40, %v769_v39  ;;  %v852_v2 = vand.u32 4294901760, %v851_v50  ;;  %v872_v5 = vsub.f32 %v3051_v37, %v871_v55 }
  0x39   : > { %2454 = vmatprep.subr.bf16.mxu1 %v2453_v15  ;;  %2492 = vmatpush3.bf16.msra.mxu0 %v2928_v26  ;;  %v3067_v26 = vpack.c.bf16 %v766_v18, %v763_v23  ;;  %v886_v16 = vsub.f32 %v3081_v57, %v885_v9  ;;  %v2545_v7 = vpack.c.bf16 %v871_v55, %v864_v54 }
  0x3a   : > { %2566 = vmatprep.subr.bf16.mxu0 %v3022_v17  ;;  %v878_v6 = vand.u32 4294901760, %v3079_v56  ;;  %v2505_v19 = vpack.c.bf16 %v859_v3, %v852_v2  ;;  %v873_v23 = vand.u32 4294901760, %v872_v5  ;;  %v2525_v62 = vpack.c.bf16 %v3081_v57, %v3079_v56 }
  0x3b   : > { %v887_v43 = vand.u32 4294901760, %v886_v16 }
  0x3c   : > { %2456 = vmatpush3.bf16.msra.mxu1 %v2453_v15  ;;  %2239 = vmatmul.mubr.f32.vlgmr.msra.gmra.mrb[0].mxu0 %v2938_v36  ;;  %v1454_v15 = vsub.f32 %v3065_v49, %v1453_v0  ;;  %v879_v18 = vsub.f32 %v3079_v56, %v878_v6  ;;  %v2509_v39 = vpack.c.bf16 %v873_v23, %v866_v20 }
  0x3d   : > { %2494 = vmatprep.subr.bf16.mxu1 %v3043_v28  ;;  %2568 = vmatpush3.bf16.msra.mxu0 %v3022_v17  ;;  %v2549_v13 = vpack.c.bf16 %v885_v9, %v878_v6 }
  0x3e   : > { %2343 = vmatprep.mubr.f32.mxu0 %v2967_v52  ;;  %2570 = vmatprep.subr.bf16.mxu0 %v3045_v29  ;;  %v1455_v34 = vand.u32 4294901760, %v1454_v15  ;;  %v880_v40 = vand.u32 4294901760, %v879_v18 }
  0x3f   : > { %2194 = vmatmul.mubr.f32.vlgmr.msra.gmra.mrb[0].mxu1 %v2950_v41 }
  0x40   : > { %2496 = vmatpush3.bf16.msra.mxu1 %v3043_v28  ;;  %2253 = vmatprep.mubr.f32.mxu1 %v2967_v52  ;;  %v1434_v52 = vand.u32 4294901760, %v1433_v61  ;;  %v2585_v44 = vpack.c.bf16 %v1455_v34, %v1448_v33  ;;  %v2513_v50 = vpack.c.bf16 %v887_v43, %v880_v40  ;;  %v2597_v61 = vpack.c.bf16 %v3065_v49, %v3063_v48 }
  0x41   : > { %2498 = vmatprep.subr.bf16.mxu1 %v3067_v26  ;;  %2572 = vmatpush3.bf16.msra.mxu0 %v3045_v29 }
  0x42   : > { %2574 = vmatprep.subr.bf16.mxu0 %v3084_v58  ;;  %v2581_v24 = vpack.c.bf16 %v1441_v11, %v1434_v52 }
  0x44   : > { %2500 = vmatpush3.bf16.msra.mxu1 %v3067_v26 }
  0x45   : > { %2502 = vmatprep.subr.bf16.mxu1 %v3098_v1  ;;  %2576 = vmatpush3.bf16.msra.mxu0 %v3084_v58 }
  0x46   : > { %2578 = vmatprep.subr.bf16.mxu0 %v2577_v10 }
  0x48   : > { %2504 = vmatpush3.bf16.msra.mxu1 %v3098_v1  ;;  %2344 = vmatmul.mubr.f32.vlgmr.msra.gmra.mrb[2].mxu0 %v2970_v53 }
  0x49   : > { %2506 = vmatprep.subr.bf16.mxu1 %v2505_v19  ;;  %2580 = vmatpush3.bf16.msra.mxu0 %v2577_v10 }
  0x4a   : > { %2358 = vmatprep.mubr.f32.mxu0 %v2933_v30  ;;  %2582 = vmatprep.subr.bf16.mxu0 %v2581_v24 }
  0x4b   : > { %2254 = vmatmul.mubr.f32.vlgmr.msra.gmra.mrb[2].mxu1 %v2970_v53  ;;  %v2593_v53 = vpack.c.bf16 %v3041_v27, %v3039_v25 }
  0x4c   : > { %2508 = vmatpush3.bf16.msra.mxu1 %v2505_v19  ;;  %2268 = vmatprep.mubr.f32.mxu1 %v2933_v30 }
  0x4d   : > { %2510 = vmatprep.subr.bf16.mxu1 %v2509_v39  ;;  %2584 = vmatpush3.bf16.msra.mxu0 %v2581_v24 }
  0x4e   : > { %2586 = vmatprep.subr.bf16.mxu0 %v2585_v44 }
  0x50   : > { %2512 = vmatpush3.bf16.msra.mxu1 %v2509_v39 }
  0x51   : > { %2514 = vmatprep.subr.bf16.mxu1 %v2513_v50  ;;  %2588 = vmatpush3.bf16.msra.mxu0 %v2585_v44 }
  0x52   : > { %2590 = vmatprep.subr.bf16.mxu0 %v2589_v51 }
  0x54   : > { %2516 = vmatpush3.bf16.msra.mxu1 %v2513_v50  ;;  %2359 = vmatmul.mubr.f32.vlgmr.msra.gmra.mrb[2].mxu0 %v2938_v36 }
  0x55   : > { %2518 = vmatprep.subr.bf16.mxu1 %v2517_v59  ;;  %2592 = vmatpush3.bf16.msra.mxu0 %v2589_v51 }
  0x56   : > { %2373 = vmatprep.mubr.f32.mxu0 %v2944_v38  ;;  %2594 = vmatprep.subr.bf16.mxu0 %v2593_v53 }
  0x57   : > { %2269 = vmatmul.mubr.f32.vlgmr.msra.gmra.mrb[2].mxu1 %v2938_v36 }
  0x58   : > { %2520 = vmatpush3.bf16.msra.mxu1 %v2517_v59  ;;  %2283 = vmatprep.mubr.f32.mxu1 %v2944_v38  ;;  %v2613_v38 = vpack.c.bf16 %v1425_v22, %v1418_v21 }
  0x59   : > { %2522 = vmatprep.subr.bf16.mxu1 %v2521_v60  ;;  %2596 = vmatpush3.bf16.msra.mxu0 %v2593_v53 }
  0x5a   : > { %2598 = vmatprep.subr.bf16.mxu0 %v2597_v61 }
  0x5c   : > { %2524 = vmatpush3.bf16.msra.mxu1 %v2521_v60 }
  0x5d   : > { %2526 = vmatprep.subr.bf16.mxu1 %v2525_v62  ;;  %2600 = vmatpush3.bf16.msra.mxu0 %v2597_v61 }
  0x5e   : > { %2602 = vmatprep.subr.bf16.mxu0 %v3022_v17 }
  0x60   : > { %2528 = vmatpush3.bf16.msra.mxu1 %v2525_v62  ;;  %2374 = vmatmul.mubr.f32.vlgmr.msra.gmra.mrb[2].mxu0 %v2950_v41 }
  0x61   : > { %2530 = vmatprep.subr.bf16.mxu1 %v3043_v28  ;;  %2604 = vmatpush3.bf16.msra.mxu0 %v3022_v17 }
  0x62   : > { %2388 = vmatprep.mubr.f32.mxu0 %v2953_v42  ;;  %2606 = vmatprep.subr.bf16.mxu0 %v3045_v29 }
  0x63   : > { %2284 = vmatmul.mubr.f32.vlgmr.msra.gmra.mrb[2].mxu1 %v2950_v41  ;;  %v2541_v41 = vpack.c.bf16 %v857_v32, %v850_v31 }
  0x64   : > { %2532 = vmatpush3.bf16.msra.mxu1 %v3043_v28  ;;  %2298 = vmatprep.mubr.f32.mxu1 %v2953_v42  ;;  %v2617_v42 = vpack.c.bf16 %v1439_v47, %v1432_v46 }
  0x65   : > { %2534 = vmatprep.subr.bf16.mxu1 %v3067_v26  ;;  %2608 = vmatpush3.bf16.msra.mxu0 %v3045_v29 }
  0x66   : > { %2610 = vmatprep.subr.bf16.mxu0 %v3084_v58 }
  0x68   : > { %2536 = vmatpush3.bf16.msra.mxu1 %v3067_v26 }
  0x69   : > { %2538 = vmatprep.subr.bf16.mxu1 %v3098_v1  ;;  %2612 = vmatpush3.bf16.msra.mxu0 %v3084_v58 }
  0x6a   : > { %2614 = vmatprep.subr.bf16.mxu0 %v2613_v38 }
  0x6c   : > { %2540 = vmatpush3.bf16.msra.mxu1 %v3098_v1  ;;  %2389 = vmatmul.mubr.f32.vlgmr.msra.gmra.mrb[2].mxu0 %v2956_v45 }
  0x6d   : > { %2542 = vmatprep.subr.bf16.mxu1 %v2541_v41  ;;  %2616 = vmatpush3.bf16.msra.mxu0 %v2613_v38 }
  0x6e   : > { %2403 = vmatprep.mubr.f32.mxu0 %v2933_v30  ;;  %2618 = vmatprep.subr.bf16.mxu0 %v2617_v42 }
  0x6f   : > { %2299 = vmatmul.mubr.f32.vlgmr.msra.gmra.mrb[2].mxu1 %v2956_v45 }
  0x70   : > { %2544 = vmatpush3.bf16.msra.mxu1 %v2541_v41  ;;  %2313 = vmatprep.mubr.f32.mxu1 %v2933_v30 }
  0x71   : > { %2546 = vmatprep.subr.bf16.mxu1 %v2545_v7  ;;  %2620 = vmatpush3.bf16.msra.mxu0 %v2617_v42 }
  0x72   : > { %2622 = vmatprep.subr.bf16.mxu0 %v2621_v8 }
  0x74   : > { %2548 = vmatpush3.bf16.msra.mxu1 %v2545_v7 }
  0x75   : > { %2550 = vmatprep.subr.bf16.mxu1 %v2549_v13  ;;  %2624 = vmatpush3.bf16.msra.mxu0 %v2621_v8 }
  0x76   : > { %2626 = vmatprep.subr.bf16.mxu0 %v3022_v17 }
  0x78   : > { %2552 = vmatpush3.bf16.msra.mxu1 %v2549_v13  ;;  %2404 = vmatmul.mubr.f32.vlgmr.msra.gmra.mrb[2].mxu0 %v2938_v36 }
  0x79   : > { %2554 = vmatprep.subr.bf16.mxu1 %v3043_v28  ;;  %2628 = vmatpush3.bf16.msra.mxu0 %v3022_v17 }
  0x7a   : > { %2418 = vmatprep.mubr.f32.mxu0 %v2933_v30  ;;  %2630 = vmatprep.subr.bf16.mxu0 %v3045_v29 }
  0x7b   : > { %2314 = vmatmul.mubr.f32.vlgmr.msra.gmra.mrb[2].mxu1 %v2938_v36 }
  0x7c   : > { %2556 = vmatpush3.bf16.msra.mxu1 %v3043_v28  ;;  %2328 = vmatprep.mubr.f32.mxu1 %v2933_v30 }
  0x7d   : > { %2558 = vmatprep.subr.bf16.mxu1 %v3067_v26  ;;  %2632 = vmatpush3.bf16.msra.mxu0 %v3045_v29 }
  0x7e   : > { %2634 = vmatprep.subr.bf16.mxu0 %v3084_v58 }
  0x80   : > { %2560 = vmatpush3.bf16.msra.mxu1 %v3067_v26 }
  0x81   : > { %2562 = vmatprep.subr.bf16.mxu1 %v3098_v1  ;;  %2636 = vmatpush3.bf16.msra.mxu0 %v3084_v58 }
  0x84   : > { %2564 = vmatpush3.bf16.msra.mxu1 %v3098_v1  ;;  %2419 = vmatmul.mubr.f32.vlgmr.msra.gmra.mrb[2].mxu0 %v2938_v36 }
  0x87   : > { %2329 = vmatmul.mubr.f32.vlgmr.msra.gmra.mrb[2].mxu1 %v2938_v36 }
 0x10f   : > { %v2240_v30 = vpop.f32.mrb[0].mxu0 }
 0x110   : > { %v732_v45 = vpop.f32.mrb[1].mxu0 }
 0x112   : > { %v2195_v14 = vpop.f32.mrb[0].mxu1 }
 0x113   : > { %v2637_v17 = vadd.f32 %v2240_v30, %v2195_v14  ;;  %v466_v21 = vpop.f32.mrb[1].mxu1 }
 0x114   : > { %v2638_v22 = vadd.f32 %v732_v45, %v466_v21 }
 0x115   : > { %v743_v25 = vmul.f32 0.017124753, %v2637_v17 }
 0x116   : > { %v742_v27 = vmul.f32 0.017124753, %v2638_v22 }
 0x117   : > { %v745_v28 = vadd.f32 -2.117904, %v743_v25 }
 0x118   : > { %v744_v29 = vadd.f32 -2.117904, %v742_v27 }
 0x119   : > { %748 = vst.msk [vmem:[%s161_s30 + $0x8] sm:$0xff] %vm746_vm1, %v745_v28 }
 0x11a   : > { %747 = vst.msk [vmem:[%s161_s30] sm:$0xff] %vm746_vm1, %v744_v29 }
 0x157   : > { %v2420_v36 = vpop.f32.mrb[2].mxu0 }
 0x158   : > { %v1879_v31 = vmul.f32 0.017429193, %v2420_v36  ;;  %v1868_v32 = vpop.f32.mrb[3].mxu0 }
 0x159   : > { %v1878_v37 = vmul.f32 0.017429193, %v1868_v32 }
 0x15a   : > { %v2330_v35 = vpop.f32.mrb[2].mxu1  ;;  %v1881_v46 = vadd.f32 -1.8044444, %v1879_v31 }
 0x15b   : > { %v1311_v47 = vmul.f32 0.017507004, %v2330_v35  ;;  %v1300_v48 = vpop.f32.mrb[3].mxu1  ;;  %v1880_v49 = vadd.f32 -1.8044444, %v1878_v37 }
 0x15c   : > { %v1310_v26 = vmul.f32 0.017507004, %v1300_v48  ;;  %2002 = vst.msk [vmem:[%s161_s30 + $0x28] sm:$0xff] %vm746_vm1, %v1881_v46 }
 0x15d   : > { %v1313_v54 = vadd.f32 -2.0357144, %v1311_v47  ;;  %2001 = vst.msk [vmem:[%s161_s30 + $0x20] sm:$0xff] %vm746_vm1, %v1880_v49 }
 0x15e   : > { %v1312_v55 = vadd.f32 -2.0357144, %v1310_v26 }
 0x15f   : > { %1994 = vst.msk [vmem:[%s161_s30 + $0x18] sm:$0xff] %vm746_vm1, %v1313_v54 }
 0x160   : > { %1993 = vst.msk [vmem:[%s161_s30 + $0x10] sm:$0xff] %vm746_vm1, %v1312_v55 }
 0x161   : > { %2739 = shalt.err (!%p2736_p5)
}
 0x162   : > { %s2740_s20 = scalar_lea.hbm %s3220_s7, 768  ;;  %s2744_s25 = scalar_lea.hbm %s3277_s2, 1536 }
 0x163   : > { %p2741_p6 = scmp.ne.s32.totalorder %s3220_s7, %s2740_s20  ;;  %p2745_p10 = scmp.lt.u32.totalorder %s3220_s7, %s3277_s2 }
 0x164   : > { %p2746_p11 = scmp.lt.u32.totalorder %s2744_s25, %s2740_s20  ;;  %p2748_p13 = scmp.lt.u32.totalorder %s2740_s20, %s3220_s7 }
 0x165   : > { %p2742_p7 = pnand %p2741_p6, %p2864_p4 }
 0x166   : > { %p2747_p12 = por %p2746_p11, %p2745_p10 }
 0x167   : > { %p2743_p9 = pneg %p2742_p7 }
 0x168   : > { %p2749_p0 = por %p2748_p13, %p2747_p12 }
 0x16a   : > { %p2750_p1 = pnand %p2749_p0, %p2743_p9 }
 0x16c   : > { %2753 = shalt.err (!%p2750_p1)
}
 0x16d   : > { %s2807_s28 = smov 128   ;;  %s2808_s29 = smov 8  }
 0x16e   : > { %2669 = dma.vmem_to_hbm [thread:$0]  (%p2864_p4), %s3222_s4, 768, %s3220_s7, %s3229_s12, %s2807_s28, %s2807_s28, %s2808_s29  }
 0x16f PF: > { %p2675_p2 = scmp.ge.s32.totalorder %s2804_s14, 2  ;;  %s1916_s30 = sand.u32 1, %s2784_s9  }
 0x170   : > { %s1917_s3 = scalar_lea.sflag [#allocation3], %s1916_s30 }
 0x171   : > { %p2672_p3 = pnand %p2675_p2, %p2871_p8 }
 0x173   : > { %2779 = dma.done.wait (!%p2672_p3), %s1917_s3, 768  }
 0x174   : > { %2781 = vsyncadd (!%p2672_p3), %s1917_s3, 4294966528  ;;  %s15_s14 = sadd.s32 1, %s2804_s14   ;;  %s3280_s9 = smov %s2788_s10 }
 0x175   : > { %p12_p5 = scmp.ge.s32.totalorder %s15_s14, 4   ;;  %s3281_s10 = smov %s2792_s11 }
 0x176   : > { %s3282_s11 = smov %s2877_s22  ;;  %s3283_s12 = smov %s2800_s13 }
 0x177   : > { %s3284_s13 = smov %s3286_s17  ;;  %14 = sbr.rel (!%p12_p5) target bundleno = 4 (0x4), region = 67 }
 0x17e   :  { %1922 = vsyncpa [#allocation3], 1 }
 0x17f   :  { %1924 = vsyncpa [#allocation3 + $0x1], 1 }

</bundles_post_ra>
